<compile_context>
chip_gen: v6e
topology: v6e:2x2x1
jax: 0.10.0
libtpu: 0.0.40
codegen_flags: <defaults>
</compile_context>

<pallas_src>
import jax
import jax.numpy as jnp
from jax import lax
from jax.experimental import pallas as pl
from jax.experimental.pallas import tpu as pltpu


def _mlp_kernel(x_ref,
                w1_ref, b1_ref,
                w2_ref, b2_ref,
                w3_ref, b3_ref,
                o_ref):
    """Fused MLP forward for one batch tile.

    x  : (bt, d_in)   activations, natural layout, streamed as f32
    w1 : (d1, d_in)   b1: (d1, 1)    BN1 already folded in
    w2 : (d2, d1)     b2: (d2, 1)    BN2 already folded in
    w3 : (d2, 1)      b3: (1, 1)     final Linear(., 1)
    o  : (1, bt)      lane-dense output row (batch on lanes)
    """
    # Cast the streamed f32 tile to the matmul dtype in-register (free VPU op).
    x = x_ref[...].astype(w1_ref.dtype)                      # (bt, d_in)

    # Layer 1 as w1 @ x^T (contract last dims of both operands) -> (d1, bt).
    # Puts the batch dim on lanes so every later VPU/XLU op is fully packed.
    h1 = lax.dot_general(
        w1_ref[...], x,
        dimension_numbers=(((1,), (1,)), ((), ())),
        preferred_element_type=jnp.float32)                  # (d1, bt)
    h1 = jnp.maximum(h1 + b1_ref[...], 0.0)
    # TODO(synk): Dropout is identity in eval mode; training-mode dropout
    # (pltpu.prng_random_bits mask) is intentionally not emitted.

    # Layer 2: standard (d2, d1) @ (d1, bt) MXU matmul, f32 accumulation.
    h2 = jnp.dot(w2_ref[...], h1.astype(w2_ref.dtype),
                 preferred_element_type=jnp.float32)         # (d2, bt)
    h2 = jnp.maximum(h2 + b2_ref[...], 0.0)

    # Output layer has N=1: VPU multiply + sublane (XLU) reduction beats an
    # MXU matmul with a single output column.
    y = jnp.sum(h2 * w3_ref[...], axis=0, keepdims=True) + b3_ref[...]
    o_ref[...] = y.astype(o_ref.dtype)                       # (1, bt)


def mlp_forward(x, params, *, batch_tile=None, compute_dtype=jnp.bfloat16):
    """Run the fused MLP Pallas kernel.

    x: (B, input_dim) float32
    params: dict of arrays (see init_params). Returns (B, 1) float32.
    """
    B, d_in = x.shape
    eps = 1e-5

    # ---- Fold BatchNorm1d (eval mode) directly into the Linear weights. ----
    s1 = params["bn1_gamma"] / jnp.sqrt(params["bn1_var"] + eps)
    t1 = params["bn1_beta"] - params["bn1_mean"] * s1
    s2 = params["bn2_gamma"] / jnp.sqrt(params["bn2_var"] + eps)
    t2 = params["bn2_beta"] - params["bn2_mean"] * s2

    w1 = params["w1"] * s1[:, None]                    # (d1, d_in)
    b1 = (params["b1"] * s1 + t1)[:, None]             # (d1, 1)
    w2 = params["w2"] * s2[:, None]                    # (d2, d1)
    b2 = (params["b2"] * s2 + t2)[:, None]             # (d2, 1)
    w3 = params["w3"].reshape(-1, 1)                   # (d2, 1)  (torch: (1, d2))
    b3 = params["b3"].reshape(1, 1)                    # (1, 1)

    # Keep the contraction axis sublane-friendly for the in-kernel w1 @ x^T
    # (no-op for typical feature dims like 16/32; only pads odd d_in).
    pad_k = (-d_in) % 8
    if pad_k:
        x = jnp.pad(x, ((0, 0), (0, pad_k)))
        w1 = jnp.pad(w1, ((0, 0), (0, pad_k)))
        d_in += pad_k

    d1 = w1.shape[0]
    d2 = w2.shape[0]

    # ---- Tile selection: lane-aligned batch tile, full block when small. ----
    if batch_tile is None:
        batch_tile = 2048       # ~140 KiB HBM traffic/step; amortizes overhead
    if B <= batch_tile:
        batch_tile = B          # single full-extent block (no 8/128 constraint)
        grid_b = 1
    else:
        batch_tile = max(128, (batch_tile // 128) * 128)   # lane-aligned tile
        grid_b = pl.cdiv(B, batch_tile)
    B_pad = grid_b * batch_tile
    if B_pad != B:
        x = jnp.pad(x, ((0, B_pad - B), (0, 0)))           # tail-tile padding

    # ---- Prepare resident operands (weights are tiny; cast is free). --------
    w1c = w1.astype(compute_dtype)
    w2c = w2.astype(compute_dtype)
    b1c = b1.astype(jnp.float32)
    b2c = b2.astype(jnp.float32)
    w3c = w3.astype(jnp.float32)
    b3c = b3.astype(jnp.float32)

    # Constant-index-map blocks (weights/biases) are not re-DMA'd per grid
    # step, so only the x tile and the output row stream HBM<->VMEM.
    full = lambda a: pl.BlockSpec(a.shape, lambda i: (0, 0))

    w_itemsize = jnp.dtype(compute_dtype).itemsize
    flops = 2 * B_pad * (d_in * d1 + d1 * d2 + d2 * 1)
    bytes_accessed = (x.size * x.dtype.itemsize
                      + (w1c.size + w2c.size) * w_itemsize
                      + (b1c.size + b2c.size + w3c.size + b3c.size) * 4
                      + B_pad * 4)
    cost = pl.CostEstimate(flops=flops, transcendentals=0,
                           bytes_accessed=bytes_accessed)

    out = pl.pallas_call(
        _mlp_kernel,
        out_shape=jax.ShapeDtypeStruct((1, B_pad), jnp.float32),
        grid_spec=pltpu.PrefetchScalarGridSpec(
            num_scalar_prefetch=0,
            grid=(grid_b,),
            in_specs=[
                pl.BlockSpec((batch_tile, d_in), lambda i: (i, 0)),   # x tile
                full(w1c), full(b1c),
                full(w2c), full(b2c),
                full(w3c), full(b3c),
            ],
            out_specs=pl.BlockSpec((1, batch_tile), lambda i: (0, i)),
        ),
        compiler_params=pltpu.CompilerParams(
            dimension_semantics=("parallel",)),   # megacore-shardable on v7x
        cost_estimate=cost,
    )(x, w1c, b1c, w2c, b2c, w3c, b3c)

    return out[0, :B][:, None]                     # back to torch-style (B, 1)


def init_params(key, input_dim, embed_dims):
    """Deterministic parameter init matching the module's __init__ shapes."""
    if isinstance(embed_dims, int):
        embed_dims = (embed_dims, embed_dims)
    d1, d2 = embed_dims
    ks = jax.random.split(key, 6)

    def linear_init(kw, kb, fan_in, fan_out):
        bound = 1.0 / jnp.sqrt(fan_in)
        w = jax.random.uniform(kw, (fan_out, fan_in), jnp.float32, -bound, bound)
        b = jax.random.uniform(kb, (fan_out,), jnp.float32, -bound, bound)
        return w, b

    w1, b1 = linear_init(ks[0], ks[1], input_dim, d1)
    w2, b2 = linear_init(ks[2], ks[3], d1, d2)
    w3, b3 = linear_init(ks[4], ks[5], d2, 1)

    return dict(
        w1=w1, b1=b1, w2=w2, b2=b2, w3=w3, b3=b3,
        # BatchNorm1d defaults: gamma=1, beta=0, running_mean=0, running_var=1
        bn1_gamma=jnp.ones((d1,), jnp.float32),
        bn1_beta=jnp.zeros((d1,), jnp.float32),
        bn1_mean=jnp.zeros((d1,), jnp.float32),
        bn1_var=jnp.ones((d1,), jnp.float32),
        bn2_gamma=jnp.ones((d2,), jnp.float32),
        bn2_beta=jnp.zeros((d2,), jnp.float32),
        bn2_mean=jnp.zeros((d2,), jnp.float32),
        bn2_var=jnp.ones((d2,), jnp.float32),
    )


def mlp_reference(x, params):
    """Pure-JAX reference of the same eval-mode forward (torch layout)."""
    eps = 1e-5
    h = x @ params["w1"].T + params["b1"]
    h = (h - params["bn1_mean"]) / jnp.sqrt(params["bn1_var"] + eps)
    h = h * params["bn1_gamma"] + params["bn1_beta"]
    h = jnp.maximum(h, 0.0)
    h = h @ params["w2"].T + params["b2"]
    h = (h - params["bn2_mean"]) / jnp.sqrt(params["bn2_var"] + eps)
    h = h * params["bn2_gamma"] + params["bn2_beta"]
    h = jnp.maximum(h, 0.0)
    return h @ params["w3"].T + params["b3"]


if __name__ == "__main__":
    key = jax.random.PRNGKey(0)
    k_x, k_p = jax.random.split(key)

    batch = 1024
    input_dim = 16
    embed_dims = (32, 32)
    dropout = 0.5           # identity in eval mode

    x = jax.random.normal(k_x, (batch, input_dim), jnp.float32)
    params = init_params(k_p, input_dim, embed_dims)

    ref = mlp_reference(x, params)

    # Exact path (f32 matmul operands), single full-extent block.
    out_f32 = jax.block_until_ready(
        mlp_forward(x, params, compute_dtype=jnp.float32))
    assert out_f32.shape == (batch, 1)
    assert jnp.allclose(out_f32, ref, atol=1e-4, rtol=1e-4)

    # Fast path (bf16 matmul operands, f32 accumulation), single block.
    out_bf16 = jax.block_until_ready(mlp_forward(x, params))
    assert out_bf16.shape == (batch, 1)
    assert jnp.allclose(out_bf16, ref, atol=5e-2, rtol=5e-2)

    # Multi-step pipelined grid (4 batch tiles of 256 rows).
    out_tiled = jax.block_until_ready(mlp_forward(x, params, batch_tile=256))
    assert out_tiled.shape == (batch, 1)
    assert jnp.allclose(out_tiled, ref, atol=5e-2, rtol=5e-2)

    # Non-divisible batch: exercises the tail-padding path.
    x_odd = x[:1000]
    out_odd = jax.block_until_ready(mlp_forward(x_odd, params, batch_tile=256))
    assert out_odd.shape == (1000, 1)
    assert jnp.allclose(out_odd, ref[:1000], atol=5e-2, rtol=5e-2)

    print("KERNEL_OK")
</pallas_src>

<mosaic_0001>
module attributes {stable_mosaic.version = 11 : i64} {
  func.func @_mlp_kernel(%arg0: i32, %arg1: memref<1024x16xf32, #tpu.memory_space<vmem>>, %arg2: memref<32x16xf32, #tpu.memory_space<vmem>>, %arg3: memref<32x1xf32, #tpu.memory_space<vmem>>, %arg4: memref<32x32xf32, #tpu.memory_space<vmem>>, %arg5: memref<32x1xf32, #tpu.memory_space<vmem>>, %arg6: memref<32x1xf32, #tpu.memory_space<vmem>>, %arg7: memref<1x1xf32, #tpu.memory_space<vmem>>, %arg8: memref<1x1024xf32, #tpu.memory_space<vmem>>) attributes {dimension_semantics = [#tpu.dimension_semantics<parallel>], iteration_bounds = array<i64: 1>, scalar_prefetch = 0 : i64, scratch_operands = 0 : i64, tpu.core_type = #tpu.core_type<tc>, window_params = [{transform_indices = @transform_0, window_bounds = array<i64: 1024, 16>}, {pipeline_mode = #tpu.pipeline_mode<synchronous>, transform_indices = @transform_1, window_bounds = array<i64: 32, 16>}, {pipeline_mode = #tpu.pipeline_mode<synchronous>, transform_indices = @transform_2, window_bounds = array<i64: 32, 1>}, {pipeline_mode = #tpu.pipeline_mode<synchronous>, transform_indices = @transform_3, window_bounds = array<i64: 32, 32>}, {pipeline_mode = #tpu.pipeline_mode<synchronous>, transform_indices = @transform_4, window_bounds = array<i64: 32, 1>}, {pipeline_mode = #tpu.pipeline_mode<synchronous>, transform_indices = @transform_5, window_bounds = array<i64: 32, 1>}, {pipeline_mode = #tpu.pipeline_mode<synchronous>, transform_indices = @transform_6, window_bounds = array<i64: 1, 1>}, {transform_indices = @transform_7, window_bounds = array<i64: 1, 1024>}]} {
    %c0 = arith.constant 0 : index
    %c0_0 = arith.constant 0 : index
    %0 = vector.load %arg1[%c0, %c0_0] : memref<1024x16xf32, #tpu.memory_space<vmem>>, vector<1024x16xf32>
    %c0_1 = arith.constant 0 : index
    %c0_2 = arith.constant 0 : index
    %1 = vector.load %arg2[%c0_1, %c0_2] : memref<32x16xf32, #tpu.memory_space<vmem>>, vector<32x16xf32>
    %cst = arith.constant dense<0.000000e+00> : vector<32x1024xf32>
    %2 = tpu.matmul %1, %0, %cst {dimension_numbers = #tpu.dot_dimension_numbers<[1], [1], [0], [0], [0, 0, 1, 0], [], []>} : vector<32x16xf32>, vector<1024x16xf32>, vector<32x1024xf32> -> vector<32x1024xf32>
    %c0_3 = arith.constant 0 : index
    %c0_4 = arith.constant 0 : index
    %3 = vector.load %arg3[%c0_3, %c0_4] : memref<32x1xf32, #tpu.memory_space<vmem>>, vector<32x1xf32>
    %4 = vector.broadcast %3 : vector<32x1xf32> to vector<32x1024xf32>
    %5 = arith.addf %2, %4 : vector<32x1024xf32>
    %cst_5 = arith.constant 0.000000e+00 : f32
    %6 = vector.broadcast %cst_5 : f32 to vector<32x1024xf32>
    %7 = arith.maximumf %5, %6 : vector<32x1024xf32>
    %c0_6 = arith.constant 0 : index
    %c0_7 = arith.constant 0 : index
    %8 = vector.load %arg4[%c0_6, %c0_7] : memref<32x32xf32, #tpu.memory_space<vmem>>, vector<32x32xf32>
    %cst_8 = arith.constant dense<0.000000e+00> : vector<32x1024xf32>
    %9 = tpu.matmul %8, %7, %cst_8 {dimension_numbers = #tpu.dot_dimension_numbers<[1], [0], [0], [1], [0, 0, 1, 1], [], []>} : vector<32x32xf32>, vector<32x1024xf32>, vector<32x1024xf32> -> vector<32x1024xf32>
    %c0_9 = arith.constant 0 : index
    %c0_10 = arith.constant 0 : index
    %10 = vector.load %arg5[%c0_9, %c0_10] : memref<32x1xf32, #tpu.memory_space<vmem>>, vector<32x1xf32>
    %11 = vector.broadcast %10 : vector<32x1xf32> to vector<32x1024xf32>
    %12 = arith.addf %9, %11 : vector<32x1024xf32>
    %cst_11 = arith.constant 0.000000e+00 : f32
    %13 = vector.broadcast %cst_11 : f32 to vector<32x1024xf32>
    %14 = arith.maximumf %12, %13 : vector<32x1024xf32>
    %c0_12 = arith.constant 0 : index
    %c0_13 = arith.constant 0 : index
    %15 = vector.load %arg6[%c0_12, %c0_13] : memref<32x1xf32, #tpu.memory_space<vmem>>, vector<32x1xf32>
    %16 = vector.broadcast %15 : vector<32x1xf32> to vector<32x1024xf32>
    %17 = arith.mulf %14, %16 : vector<32x1024xf32>
    %cst_14 = arith.constant dense<0.000000e+00> : vector<1024xf32>
    %18 = vector.multi_reduction <add>, %17, %cst_14 [0] : vector<32x1024xf32> to vector<1024xf32>
    %19 = vector.shape_cast %18 : vector<1024xf32> to vector<1x1024xf32>
    %c0_15 = arith.constant 0 : index
    %c0_16 = arith.constant 0 : index
    %20 = vector.load %arg7[%c0_15, %c0_16] : memref<1x1xf32, #tpu.memory_space<vmem>>, vector<1x1xf32>
    %21 = vector.broadcast %20 : vector<1x1xf32> to vector<1x1024xf32>
    %22 = arith.addf %19, %21 : vector<1x1024xf32>
    %c0_17 = arith.constant 0 : index
    %c0_18 = arith.constant 0 : index
    %23 = vector.load %arg8[%c0_17, %c0_18] : memref<1x1024xf32, #tpu.memory_space<vmem>>, vector<1x1024xf32>
    tpu.vector_store %arg8[%c0_17, %c0_18], %22 {strides = array<i32>} : memref<1x1024xf32, #tpu.memory_space<vmem>>, vector<1x1024xf32>,
    return
  }
  func.func @transform_0(%arg0: i32) -> (i32, i32) {
    %c0_i32 = arith.constant 0 : i32
    %c0_i32_0 = arith.constant 0 : i32
    return %arg0, %c0_i32 : i32, i32
  }
  func.func @transform_1(%arg0: i32) -> (i32, i32) {
    %c0_i32 = arith.constant 0 : i32
    %c0_i32_0 = arith.constant 0 : i32
    %c0_i32_1 = arith.constant 0 : i32
    return %c0_i32, %c0_i32_0 : i32, i32
  }
  func.func @transform_2(%arg0: i32) -> (i32, i32) {
    %c0_i32 = arith.constant 0 : i32
    %c0_i32_0 = arith.constant 0 : i32
    %c0_i32_1 = arith.constant 0 : i32
    return %c0_i32, %c0_i32_0 : i32, i32
  }
  func.func @transform_3(%arg0: i32) -> (i32, i32) {
    %c0_i32 = arith.constant 0 : i32
    %c0_i32_0 = arith.constant 0 : i32
    %c0_i32_1 = arith.constant 0 : i32
    return %c0_i32, %c0_i32_0 : i32, i32
  }
  func.func @transform_4(%arg0: i32) -> (i32, i32) {
    %c0_i32 = arith.constant 0 : i32
    %c0_i32_0 = arith.constant 0 : i32
    %c0_i32_1 = arith.constant 0 : i32
    return %c0_i32, %c0_i32_0 : i32, i32
  }
  func.func @transform_5(%arg0: i32) -> (i32, i32) {
    %c0_i32 = arith.constant 0 : i32
    %c0_i32_0 = arith.constant 0 : i32
    %c0_i32_1 = arith.constant 0 : i32
    return %c0_i32, %c0_i32_0 : i32, i32
  }
  func.func @transform_6(%arg0: i32) -> (i32, i32) {
    %c0_i32 = arith.constant 0 : i32
    %c0_i32_0 = arith.constant 0 : i32
    %c0_i32_1 = arith.constant 0 : i32
    return %c0_i32, %c0_i32_0 : i32, i32
  }
  func.func @transform_7(%arg0: i32) -> (i32, i32) {
    %c0_i32 = arith.constant 0 : i32
    %c0_i32_0 = arith.constant 0 : i32
    return %c0_i32, %arg0 : i32, i32
  }
}

</mosaic_0001>

<bundles_post_ra>
// kernel: tpu_custom_call.1
= control target key start
LH: loop header
LB: loop body
LE: loop exit
PB: predicated region body
PF: predicated region fallthrough
CT: control target
= control target key end

     0   :  { %s2858_s0 = inlined_call_operand.vmem [shape: f32[1024,16], index: 0, kind: input, shape index: {}]   ;;  %s2859_s1 = inlined_call_operand.vmem [shape: f32[32,16], index: 1, kind: input, shape index: {}]   ;;  %s2860_s2 = inlined_call_operand.vmem [shape: f32[32,1], index: 2, kind: input, shape index: {}]   ;;  %s2861_s3 = inlined_call_operand.vmem [shape: f32[32,32], index: 3, kind: input, shape index: {}]   ;;  %s2862_s4 = inlined_call_operand.vmem [shape: f32[32,1], index: 4, kind: input, shape index: {}]   ;;  %s2863_s5 = inlined_call_operand.vmem [shape: f32[32,1], index: 5, kind: input, shape index: {}]   ;;  %s2864_s6 = inlined_call_operand.<no memory space> [shape: f32[1,1], index: 6, kind: input, shape index: {}]   ;;  %s2865_s7 = inlined_call_operand.hbm [shape: f32[1,1024], index: 7, kind: output, shape index: {}]  }
   0x1   :  { %v12_v0 = vstv %s2864_s6 }
   0x2   :  { %13 = vst [vmem:[#allocation2] sm:$0x1] %v12_v0 }
   0x3   :  { %v60_v1 = vld [vmem:[%s2858_s0 + $0xf8] sm:$0xff]  ;;  %vm185_vm0 = vcmask 130048   ;;  %v59_v5 = vld [vmem:[%s2858_s0 + $0xf0] sm:$0xff]  ;;  %v58_v9 = vld [vmem:[%s2858_s0 + $0xe8] sm:$0xff]  ;;  %v1966_v11 = vmov 0  }
   0x4   :  { %v92_v2 = vld [vmem:[%s2858_s0 + $0x1f8] sm:$0xff]  ;;  %1778 = vmatprep.subr.msk.mxu0 %vm185_vm0, %v60_v1  ;;  %v91_v6 = vld [vmem:[%s2858_s0 + $0x1f0] sm:$0xff]  ;;  %v90_v10 = vld [vmem:[%s2858_s0 + $0x1e8] sm:$0xff]  ;;  %1943 = vset.pattern.permute.xlu1 %v1966_v11 }
   0x5   :  { %v44_v3 = vld [vmem:[%s2858_s0 + $0x78] sm:$0xff]  ;;  %1818 = vmatprep.subr.msk.mxu1 %vm185_vm0, %v92_v2  ;;  %v43_v7 = vld [vmem:[%s2858_s0 + $0x70] sm:$0xff]  ;;  %1942 = vset.pattern.permute.xlu0 %v1966_v11  ;;  %v42_v12 = vld [vmem:[%s2858_s0 + $0x68] sm:$0xff] }
   0x6   :  { %v76_v4 = vld [vmem:[%s2858_s0 + $0x178] sm:$0xff]  ;;  %1779 = vmatpush3.xpose.msk.msra.mxu0 %vm185_vm0, %v44_v3  ;;  %v75_v8 = vld [vmem:[%s2858_s0 + $0x170] sm:$0xff]  ;;  %v74_v13 = vld [vmem:[%s2858_s0 + $0x168] sm:$0xff] }
   0x7   :  { %1819 = vmatpush3.xpose.msk.msra.mxu1 %vm185_vm0, %v76_v4  ;;  %1780 = vmatprep.subr.msk.mxu0 %vm185_vm0, %v59_v5  ;;  %v57_v14 = vld [vmem:[%s2858_s0 + $0xe0] sm:$0xff]  ;;  %v56_v18 = vld [vmem:[%s2858_s0 + $0xd8] sm:$0xff]  ;;  %v55_v22 = vld [vmem:[%s2858_s0 + $0xd0] sm:$0xff] }
   0x8   :  { %1820 = vmatprep.subr.msk.mxu1 %vm185_vm0, %v91_v6  ;;  %v89_v15 = vld [vmem:[%s2858_s0 + $0x1e0] sm:$0xff]  ;;  %v88_v19 = vld [vmem:[%s2858_s0 + $0x1d8] sm:$0xff]  ;;  %v87_v23 = vld [vmem:[%s2858_s0 + $0x1d0] sm:$0xff] }
   0x9   :  { %v41_v16 = vld [vmem:[%s2858_s0 + $0x60] sm:$0xff]  ;;  %v40_v20 = vld [vmem:[%s2858_s0 + $0x58] sm:$0xff]  ;;  %v39_v24 = vld [vmem:[%s2858_s0 + $0x50] sm:$0xff] }
   0xa   :  { %1781 = vmatpush3.xpose.msk.msra.mxu0 %vm185_vm0, %v43_v7  ;;  %v73_v17 = vld [vmem:[%s2858_s0 + $0x160] sm:$0xff]  ;;  %v72_v21 = vld [vmem:[%s2858_s0 + $0x158] sm:$0xff]  ;;  %v71_v25 = vld [vmem:[%s2858_s0 + $0x150] sm:$0xff] }
   0xb   :  { %1821 = vmatpush3.xpose.msk.msra.mxu1 %vm185_vm0, %v75_v8  ;;  %1782 = vmatprep.subr.msk.mxu0 %vm185_vm0, %v58_v9  ;;  %v54_v26 = vld [vmem:[%s2858_s0 + $0xc8] sm:$0xff]  ;;  %v2116_v28 = vld [vmem:[%s2859_s1] sm:$0xff]  ;;  %v52_v35 = vld [vmem:[%s2858_s0 + $0xb8] sm:$0xff] }
   0xc   :  { %1822 = vmatprep.subr.msk.mxu1 %vm185_vm0, %v90_v10  ;;  %v86_v27 = vld [vmem:[%s2858_s0 + $0x1c8] sm:$0xff]  ;;  %v53_v31 = vld [vmem:[%s2858_s0 + $0xc0] sm:$0xff]  ;;  %1810 = vmatprep.mubr.msk.f32.mxu0 %vm185_vm0, %v2116_v28  ;;  %v84_v36 = vld [vmem:[%s2858_s0 + $0x1b8] sm:$0xff] }
   0xd   :  { %v38_v29 = vld [vmem:[%s2858_s0 + $0x48] sm:$0xff]  ;;  %v85_v32 = vld [vmem:[%s2858_s0 + $0x1c0] sm:$0xff]  ;;  %1850 = vmatprep.mubr.msk.f32.mxu1 %vm185_vm0, %v2116_v28  ;;  %v36_v37 = vld [vmem:[%s2858_s0 + $0x38] sm:$0xff] }
   0xe   :  { %1783 = vmatpush3.xpose.msk.msra.mxu0 %vm185_vm0, %v42_v12  ;;  %v70_v30 = vld [vmem:[%s2858_s0 + $0x148] sm:$0xff]  ;;  %v37_v33 = vld [vmem:[%s2858_s0 + $0x40] sm:$0xff]  ;;  %v68_v38 = vld [vmem:[%s2858_s0 + $0x138] sm:$0xff] }
   0xf   :  { %1823 = vmatpush3.xpose.msk.msra.mxu1 %vm185_vm0, %v74_v13  ;;  %1784 = vmatprep.subr.msk.mxu0 %vm185_vm0, %v57_v14  ;;  %v69_v34 = vld [vmem:[%s2858_s0 + $0x140] sm:$0xff]  ;;  %v51_v39 = vld [vmem:[%s2858_s0 + $0xb0] sm:$0xff]  ;;  %v50_v43 = vld [vmem:[%s2858_s0 + $0xa8] sm:$0xff] }
  0x10   :  { %1824 = vmatprep.subr.msk.mxu1 %vm185_vm0, %v89_v15  ;;  %v83_v40 = vld [vmem:[%s2858_s0 + $0x1b0] sm:$0xff]  ;;  %v82_v44 = vld [vmem:[%s2858_s0 + $0x1a8] sm:$0xff]  ;;  %v49_v47 = vld [vmem:[%s2858_s0 + $0xa0] sm:$0xff] }
  0x11   :  { %v35_v41 = vld [vmem:[%s2858_s0 + $0x30] sm:$0xff]  ;;  %v34_v45 = vld [vmem:[%s2858_s0 + $0x28] sm:$0xff]  ;;  %v81_v48 = vld [vmem:[%s2858_s0 + $0x1a0] sm:$0xff] }
  0x12   :  { %1785 = vmatpush3.xpose.msk.msra.mxu0 %vm185_vm0, %v41_v16  ;;  %v67_v42 = vld [vmem:[%s2858_s0 + $0x130] sm:$0xff]  ;;  %v66_v46 = vld [vmem:[%s2858_s0 + $0x128] sm:$0xff]  ;;  %v33_v49 = vld [vmem:[%s2858_s0 + $0x20] sm:$0xff] }
  0x13   :  { %1825 = vmatpush3.xpose.msk.msra.mxu1 %vm185_vm0, %v73_v17  ;;  %1786 = vmatprep.subr.msk.mxu0 %vm185_vm0, %v56_v18  ;;  %v65_v50 = vld [vmem:[%s2858_s0 + $0x120] sm:$0xff]  ;;  %v48_v51 = vld [vmem:[%s2858_s0 + $0x98] sm:$0xff]  ;;  %v162_v53 = vld [vmem:[%s2860_s2 + $0x8] sm:$0xff] }
  0x14   :  { %1826 = vmatprep.subr.msk.mxu1 %vm185_vm0, %v88_v19  ;;  %v80_v52 = vld [vmem:[%s2858_s0 + $0x198] sm:$0xff]  ;;  %172 = vperm.xlu1 %1943, %v162_v53   ;;  %v161_v55 = vld [vmem:[%s2860_s2] sm:$0xff]  ;;  %v163_v56 = vld [vmem:[%s2860_s2 + $0x10] sm:$0xff] }
  0x15   :  { %v164_v54 = vld [vmem:[%s2860_s2 + $0x18] sm:$0xff]  ;;  %v47_v59 = vld [vmem:[%s2858_s0 + $0x90] sm:$0xff] }
  0x16   :  { %1787 = vmatpush3.xpose.msk.msra.mxu0 %vm185_vm0, %v40_v20  ;;  %182 = vperm.xlu0 %1942, %v164_v54   ;;  %v32_v57 = vld [vmem:[%s2858_s0 + $0x18] sm:$0xff]  ;;  %v79_v60 = vld [vmem:[%s2858_s0 + $0x190] sm:$0xff] }
  0x17   :  { %1827 = vmatpush3.xpose.msk.msra.mxu1 %vm185_vm0, %v72_v21  ;;  %1788 = vmatprep.subr.msk.mxu0 %vm185_vm0, %v55_v22  ;;  %v64_v58 = vld [vmem:[%s2858_s0 + $0x118] sm:$0xff] }
  0x18   :  { %1828 = vmatprep.subr.msk.mxu1 %vm185_vm0, %v87_v23 }
  0x1a   :  { %1789 = vmatpush3.xpose.msk.msra.mxu0 %vm185_vm0, %v39_v24 }
  0x1b   :  { %1829 = vmatpush3.xpose.msk.msra.mxu1 %vm185_vm0, %v71_v25  ;;  %1790 = vmatprep.subr.msk.mxu0 %vm185_vm0, %v54_v26 }
  0x1c   :  { %1830 = vmatprep.subr.msk.mxu1 %vm185_vm0, %v86_v27 }
  0x1e   :  { %1791 = vmatpush3.xpose.msk.msra.mxu0 %vm185_vm0, %v38_v29 }
  0x1f   :  { %1831 = vmatpush3.xpose.msk.msra.mxu1 %vm185_vm0, %v70_v30  ;;  %1792 = vmatprep.subr.msk.mxu0 %vm185_vm0, %v53_v31 }
  0x20   :  { %1832 = vmatprep.subr.msk.mxu1 %vm185_vm0, %v85_v32 }
  0x22   :  { %1793 = vmatpush3.xpose.msk.msra.mxu0 %vm185_vm0, %v37_v33 }
  0x23   :  { %1833 = vmatpush3.xpose.msk.msra.mxu1 %vm185_vm0, %v69_v34  ;;  %1794 = vmatprep.subr.msk.mxu0 %vm185_vm0, %v52_v35 }
  0x24   :  { %1834 = vmatprep.subr.msk.mxu1 %vm185_vm0, %v84_v36 }
  0x26   :  { %1795 = vmatpush3.xpose.msk.msra.mxu0 %vm185_vm0, %v36_v37 }
  0x27   :  { %1835 = vmatpush3.xpose.msk.msra.mxu1 %vm185_vm0, %v68_v38  ;;  %1796 = vmatprep.subr.msk.mxu0 %vm185_vm0, %v51_v39 }
  0x28   :  { %1836 = vmatprep.subr.msk.mxu1 %vm185_vm0, %v83_v40 }
  0x2a   :  { %1797 = vmatpush3.xpose.msk.msra.mxu0 %vm185_vm0, %v35_v41 }
  0x2b   :  { %1837 = vmatpush3.xpose.msk.msra.mxu1 %vm185_vm0, %v67_v42  ;;  %1798 = vmatprep.subr.msk.mxu0 %vm185_vm0, %v50_v43 }
  0x2c   :  { %1838 = vmatprep.subr.msk.mxu1 %vm185_vm0, %v82_v44 }
  0x2e   :  { %1799 = vmatpush3.xpose.msk.msra.mxu0 %vm185_vm0, %v34_v45 }
  0x2f   :  { %1839 = vmatpush3.xpose.msk.msra.mxu1 %vm185_vm0, %v66_v46  ;;  %1800 = vmatprep.subr.msk.mxu0 %vm185_vm0, %v49_v47 }
  0x30   :  { %1840 = vmatprep.subr.msk.mxu1 %vm185_vm0, %v81_v48 }
  0x32   :  { %1801 = vmatpush3.xpose.msk.msra.mxu0 %vm185_vm0, %v33_v49 }
  0x33   :  { %1841 = vmatpush3.xpose.msk.msra.mxu1 %vm185_vm0, %v65_v50  ;;  %1802 = vmatprep.subr.msk.mxu0 %vm185_vm0, %v48_v51 }
  0x34   :  { %1842 = vmatprep.subr.msk.mxu1 %vm185_vm0, %v80_v52 }
  0x35   :  { %14 = vsyncpa [#allocation4], 0  ;;  %167 = vperm.xlu1 %1943, %v161_v55   ;;  %177 = vperm.xlu0 %1942, %v163_v56   ;;  %v974_v61 = vld [vmem:[%s2862_s4] sm:$0xff]  ;;  %v975_v62 = vld [vmem:[%s2862_s4 + $0x8] sm:$0xff]  ;;  %vm998_vm1 = vcmask 261120  }
  0x36   :  { %1803 = vmatpush3.xpose.msk.msra.mxu0 %vm185_vm0, %v32_v57  ;;  %v31_v63 = vld [vmem:[%s2858_s0 + $0x10] sm:$0xff]  ;;  %v46_v1 = vld [vmem:[%s2858_s0 + $0x88] sm:$0xff]  ;;  %v977_v4 = vld [vmem:[%s2862_s4 + $0x18] sm:$0xff] }
  0x37   :  { %1843 = vmatpush3.xpose.msk.msra.mxu1 %vm185_vm0, %v64_v58  ;;  %1804 = vmatprep.subr.msk.mxu0 %vm185_vm0, %v47_v59  ;;  %v63_v0 = vld [vmem:[%s2858_s0 + $0x110] sm:$0xff]  ;;  %v78_v2 = vld [vmem:[%s2858_s0 + $0x188] sm:$0xff]  ;;  %v45_v7 = vld [vmem:[%s2858_s0 + $0x80] sm:$0xff] }
  0x38   :  { %1844 = vmatprep.subr.msk.mxu1 %vm185_vm0, %v79_v60  ;;  %v976_v3 = vld [vmem:[%s2862_s4 + $0x10] sm:$0xff]  ;;  %v30_v5 = vld [vmem:[%s2858_s0 + $0x8] sm:$0xff]  ;;  %v77_v8 = vld [vmem:[%s2858_s0 + $0x180] sm:$0xff] }
  0x39   :  { %980 = vperm.xlu0 %1942, %v974_v61   ;;  %985 = vperm.xlu1 %1943, %v975_v62   ;;  %v62_v6 = vld [vmem:[%s2858_s0 + $0x108] sm:$0xff]  ;;  %v1399_v9 = vld [vmem:[%s2863_s5] sm:$0xff]  ;;  %v124_v13 = vld [vmem:[%s2858_s0 + $0x2f8] sm:$0xff] }
  0x3a   :  { %1805 = vmatpush3.xpose.msk.msra.mxu0 %vm185_vm0, %v31_v63  ;;  %v1400_v10 = vld [vmem:[%s2863_s5 + $0x8] sm:$0xff]  ;;  %v29_v11 = vld [vmem:[%s2858_s0] sm:$0xff]  ;;  %v156_v14 = vld [vmem:[%s2858_s0 + $0x3f8] sm:$0xff] }
  0x3b   :  { %1845 = vmatpush3.xpose.msk.msra.mxu1 %vm185_vm0, %v63_v0  ;;  %1806 = vmatprep.subr.msk.mxu0 %vm185_vm0, %v46_v1  ;;  %v61_v12 = vld [vmem:[%s2858_s0 + $0x100] sm:$0xff]  ;;  %v108_v15 = vld [vmem:[%s2858_s0 + $0x278] sm:$0xff]  ;;  %v2325_v17 = vld [vmem:[%s2859_s1 + $0x8] sm:$0xff] }
  0x3c   :  { %1846 = vmatprep.subr.msk.mxu1 %vm185_vm0, %v78_v2  ;;  %v140_v16 = vld [vmem:[%s2858_s0 + $0x378] sm:$0xff]  ;;  %v123_v18 = vld [vmem:[%s2858_s0 + $0x2f0] sm:$0xff]  ;;  %v122_v23 = vld [vmem:[%s2858_s0 + $0x2e8] sm:$0xff] }
  0x3d   :  { %990 = vperm.xlu0 %1942, %v976_v3   ;;  %995 = vperm.xlu1 %1943, %v977_v4   ;;  %v155_v19 = vld [vmem:[%s2858_s0 + $0x3f0] sm:$0xff]  ;;  %v154_v24 = vld [vmem:[%s2858_s0 + $0x3e8] sm:$0xff]  ;;  %v2383_v27 = vld [vmem:[%s2859_s1 + $0x18] sm:$0xff] }
  0x3e   :  { %1807 = vmatpush3.xpose.msk.msra.mxu0 %vm185_vm0, %v30_v5  ;;  %v107_v20 = vld [vmem:[%s2858_s0 + $0x270] sm:$0xff]  ;;  %v106_v25 = vld [vmem:[%s2858_s0 + $0x268] sm:$0xff]  ;;  %v121_v29 = vld [vmem:[%s2858_s0 + $0x2e0] sm:$0xff] }
  0x3f   :  { %1847 = vmatpush3.xpose.msk.msra.mxu1 %vm185_vm0, %v62_v6  ;;  %1808 = vmatprep.subr.msk.mxu0 %vm185_vm0, %v45_v7  ;;  %v139_v21 = vld [vmem:[%s2858_s0 + $0x370] sm:$0xff]  ;;  %v138_v26 = vld [vmem:[%s2858_s0 + $0x368] sm:$0xff]  ;;  %v153_v30 = vld [vmem:[%s2858_s0 + $0x3e0] sm:$0xff] }
  0x40   :  { %1848 = vmatprep.subr.msk.mxu1 %vm185_vm0, %v77_v8  ;;  %v2354_v22 = vld [vmem:[%s2859_s1 + $0x10] sm:$0xff]  ;;  %v105_v31 = vld [vmem:[%s2858_s0 + $0x260] sm:$0xff]  ;;  %v120_v33 = vld [vmem:[%s2858_s0 + $0x2d8] sm:$0xff] }
  0x41   :  { %1405 = vperm.xlu0 %1942, %v1399_v9   ;;  %1410 = vperm.xlu1 %1943, %v1400_v10   ;;  %v137_v32 = vld [vmem:[%s2858_s0 + $0x360] sm:$0xff]  ;;  %v152_v34 = vld [vmem:[%s2858_s0 + $0x3d8] sm:$0xff]  ;;  %v1401_v35 = vld [vmem:[%s2863_s5 + $0x10] sm:$0xff] }
  0x42   :  { %1809 = vmatpush3.xpose.msk.msra.mxu0 %vm185_vm0, %v29_v11  ;;  %v1402_v36 = vld [vmem:[%s2863_s5 + $0x18] sm:$0xff]  ;;  %v119_v39 = vld [vmem:[%s2858_s0 + $0x2d0] sm:$0xff]  ;;  %v1527_v41 = vld [vmem:[#allocation2] sm:$0x1] }
  0x43   :  { %1849 = vmatpush3.xpose.msk.msra.mxu1 %vm185_vm0, %v61_v12  ;;  %1858 = vmatprep.subr.msk.mxu0 %vm185_vm0, %v124_v13  ;;  %v104_v37 = vld [vmem:[%s2858_s0 + $0x258] sm:$0xff]  ;;  %v151_v40 = vld [vmem:[%s2858_s0 + $0x3d0] sm:$0xff]  ;;  %v118_v44 = vld [vmem:[%s2858_s0 + $0x2c8] sm:$0xff] }
  0x44   :  { %1898 = vmatprep.subr.msk.mxu1 %vm185_vm0, %v156_v14  ;;  %v136_v38 = vld [vmem:[%s2858_s0 + $0x358] sm:$0xff]  ;;  %v103_v42 = vld [vmem:[%s2858_s0 + $0x250] sm:$0xff]  ;;  %v150_v45 = vld [vmem:[%s2858_s0 + $0x3c8] sm:$0xff] }
  0x45   :  { %1811 = vmatmul.mubr.msk.f32.vlgmr.msra.gmra.mxu0 %vm185_vm0, %v2116_v28  ;;  %1415 = vperm.xlu0 %1942, %v1401_v35   ;;  %v135_v43 = vld [vmem:[%s2858_s0 + $0x350] sm:$0xff]  ;;  %v102_v46 = vld [vmem:[%s2858_s0 + $0x248] sm:$0xff]  ;;  %v117_v48 = vld [vmem:[%s2858_s0 + $0x2c0] sm:$0xff] }
  0x46   :  { %1851 = vmatmul.mubr.msk.f32.vlgmr.msra.gmra.mxu1 %vm185_vm0, %v2116_v28  ;;  %1859 = vmatpush3.xpose.msk.msra.mxu0 %vm185_vm0, %v108_v15  ;;  %v134_v47 = vld [vmem:[%s2858_s0 + $0x348] sm:$0xff]  ;;  %v149_v49 = vld [vmem:[%s2858_s0 + $0x3c0] sm:$0xff]  ;;  %v116_v52 = vld [vmem:[%s2858_s0 + $0x2b8] sm:$0xff] }
  0x47   :  { %1899 = vmatpush3.xpose.msk.msra.mxu1 %vm185_vm0, %v140_v16  ;;  %1812 = vmatprep.mubr.msk.f32.mxu0 %vm185_vm0, %v2325_v17  ;;  %v101_v50 = vld [vmem:[%s2858_s0 + $0x240] sm:$0xff]  ;;  %v148_v53 = vld [vmem:[%s2858_s0 + $0x3b8] sm:$0xff]  ;;  %v115_v56 = vld [vmem:[%s2858_s0 + $0x2b0] sm:$0xff] }
  0x48   :  { %1852 = vmatprep.mubr.msk.f32.mxu1 %vm185_vm0, %v2325_v17  ;;  %1860 = vmatprep.subr.msk.mxu0 %vm185_vm0, %v123_v18  ;;  %v133_v51 = vld [vmem:[%s2858_s0 + $0x340] sm:$0xff]  ;;  %v100_v54 = vld [vmem:[%s2858_s0 + $0x238] sm:$0xff]  ;;  %v147_v57 = vld [vmem:[%s2858_s0 + $0x3b0] sm:$0xff] }
  0x49   :  { %1900 = vmatprep.subr.msk.mxu1 %vm185_vm0, %v155_v19  ;;  %1813 = vmatmul.mubr.msk.f32.gmra.mxu0 %vm185_vm0, %v2325_v17  ;;  %v132_v55 = vld [vmem:[%s2858_s0 + $0x338] sm:$0xff]  ;;  %v99_v58 = vld [vmem:[%s2858_s0 + $0x230] sm:$0xff]  ;;  %v114_v60 = vld [vmem:[%s2858_s0 + $0x2a8] sm:$0xff] }
  0x4a   :  { %1853 = vmatmul.mubr.msk.f32.gmra.mxu1 %vm185_vm0, %v2325_v17  ;;  %1861 = vmatpush3.xpose.msk.msra.mxu0 %vm185_vm0, %v107_v20  ;;  %v131_v59 = vld [vmem:[%s2858_s0 + $0x330] sm:$0xff]  ;;  %v146_v61 = vld [vmem:[%s2858_s0 + $0x3a8] sm:$0xff]  ;;  %v113_v0 = vld [vmem:[%s2858_s0 + $0x2a0] sm:$0xff] }
  0x4b   :  { %1901 = vmatpush3.xpose.msk.msra.mxu1 %vm185_vm0, %v139_v21  ;;  %1814 = vmatprep.mubr.msk.f32.mxu0 %vm185_vm0, %v2354_v22  ;;  %v98_v62 = vld [vmem:[%s2858_s0 + $0x228] sm:$0xff]  ;;  %v145_v1 = vld [vmem:[%s2858_s0 + $0x3a0] sm:$0xff]  ;;  %v112_v4 = vld [vmem:[%s2858_s0 + $0x298] sm:$0xff] }
  0x4c   :  { %1854 = vmatprep.mubr.msk.f32.mxu1 %vm185_vm0, %v2354_v22  ;;  %1862 = vmatprep.subr.msk.mxu0 %vm185_vm0, %v122_v23  ;;  %v130_v63 = vld [vmem:[%s2858_s0 + $0x328] sm:$0xff]  ;;  %v97_v2 = vld [vmem:[%s2858_s0 + $0x220] sm:$0xff]  ;;  %v144_v5 = vld [vmem:[%s2858_s0 + $0x398] sm:$0xff] }
  0x4d   :  { %1902 = vmatprep.subr.msk.mxu1 %vm185_vm0, %v154_v24  ;;  %1815 = vmatmul.mubr.msk.f32.gmra.mxu0 %vm185_vm0, %v2354_v22  ;;  %v129_v3 = vld [vmem:[%s2858_s0 + $0x320] sm:$0xff]  ;;  %v96_v6 = vld [vmem:[%s2858_s0 + $0x218] sm:$0xff]  ;;  %v111_v8 = vld [vmem:[%s2858_s0 + $0x290] sm:$0xff] }
  0x4e   :  { %1855 = vmatmul.mubr.msk.f32.gmra.mxu1 %vm185_vm0, %v2354_v22  ;;  %1863 = vmatpush3.xpose.msk.msra.mxu0 %vm185_vm0, %v106_v25  ;;  %v128_v7 = vld [vmem:[%s2858_s0 + $0x318] sm:$0xff]  ;;  %v143_v9 = vld [vmem:[%s2858_s0 + $0x390] sm:$0xff]  ;;  %v110_v12 = vld [vmem:[%s2858_s0 + $0x288] sm:$0xff] }
  0x4f   :  { %1903 = vmatpush3.xpose.msk.msra.mxu1 %vm185_vm0, %v138_v26  ;;  %1816 = vmatprep.mubr.msk.f32.mxu0 %vm185_vm0, %v2383_v27  ;;  %v95_v10 = vld [vmem:[%s2858_s0 + $0x210] sm:$0xff]  ;;  %v142_v13 = vld [vmem:[%s2858_s0 + $0x388] sm:$0xff]  ;;  %v109_v16 = vld [vmem:[%s2858_s0 + $0x280] sm:$0xff] }
  0x50   :  { %1856 = vmatprep.mubr.msk.f32.mxu1 %vm185_vm0, %v2383_v27  ;;  %1864 = vmatprep.subr.msk.mxu0 %vm185_vm0, %v121_v29  ;;  %v127_v11 = vld [vmem:[%s2858_s0 + $0x310] sm:$0xff]  ;;  %v94_v14 = vld [vmem:[%s2858_s0 + $0x208] sm:$0xff]  ;;  %v141_v18 = vld [vmem:[%s2858_s0 + $0x380] sm:$0xff] }
  0x51   :  { %1904 = vmatprep.subr.msk.mxu1 %vm185_vm0, %v153_v30  ;;  %1817 = vmatmul.mubr.msk.f32.gmra.mxu0 %vm185_vm0, %v2383_v27  ;;  %v126_v15 = vld [vmem:[%s2858_s0 + $0x308] sm:$0xff]  ;;  %v93_v19 = vld [vmem:[%s2858_s0 + $0x200] sm:$0xff] }
  0x52   :  { %1857 = vmatmul.mubr.msk.f32.gmra.mxu1 %vm185_vm0, %v2383_v27  ;;  %1865 = vmatpush3.xpose.msk.msra.mxu0 %vm185_vm0, %v105_v31  ;;  %v125_v20 = vld [vmem:[%s2858_s0 + $0x300] sm:$0xff] }
  0x53   :  { %1905 = vmatpush3.xpose.msk.msra.mxu1 %vm185_vm0, %v137_v32  ;;  %1866 = vmatprep.subr.msk.mxu0 %vm185_vm0, %v120_v33 }
  0x54   :  { %1906 = vmatprep.subr.msk.mxu1 %vm185_vm0, %v152_v34  ;;  %1890 = vmatprep.mubr.msk.f32.mxu0 %vm185_vm0, %v2116_v28 }
  0x55   :  { %1930 = vmatprep.mubr.msk.f32.mxu1 %vm185_vm0, %v2116_v28  ;;  %1420 = vperm.xlu1 %1943, %v1402_v36  }
  0x56   :  { %1867 = vmatpush3.xpose.msk.msra.mxu0 %vm185_vm0, %v104_v37  ;;  %1530 = vperm.xlu0 %1942, %v1527_v41  }
  0x57   :  { %1907 = vmatpush3.xpose.msk.msra.mxu1 %vm185_vm0, %v136_v38  ;;  %1868 = vmatprep.subr.msk.mxu0 %vm185_vm0, %v119_v39 }
  0x58   :  { %1908 = vmatprep.subr.msk.mxu1 %vm185_vm0, %v151_v40 }
  0x5a   :  { %1869 = vmatpush3.xpose.msk.msra.mxu0 %vm185_vm0, %v103_v42 }
  0x5b   :  { %1909 = vmatpush3.xpose.msk.msra.mxu1 %vm185_vm0, %v135_v43  ;;  %1870 = vmatprep.subr.msk.mxu0 %vm185_vm0, %v118_v44 }
  0x5c   :  { %1910 = vmatprep.subr.msk.mxu1 %vm185_vm0, %v150_v45 }
  0x5e   :  { %1871 = vmatpush3.xpose.msk.msra.mxu0 %vm185_vm0, %v102_v46 }
  0x5f   :  { %1911 = vmatpush3.xpose.msk.msra.mxu1 %vm185_vm0, %v134_v47  ;;  %1872 = vmatprep.subr.msk.mxu0 %vm185_vm0, %v117_v48 }
  0x60   :  { %1912 = vmatprep.subr.msk.mxu1 %vm185_vm0, %v149_v49 }
  0x62   :  { %1873 = vmatpush3.xpose.msk.msra.mxu0 %vm185_vm0, %v101_v50 }
  0x63   :  { %1913 = vmatpush3.xpose.msk.msra.mxu1 %vm185_vm0, %v133_v51  ;;  %1874 = vmatprep.subr.msk.mxu0 %vm185_vm0, %v116_v52 }
  0x64   :  { %1914 = vmatprep.subr.msk.mxu1 %vm185_vm0, %v148_v53 }
  0x66   :  { %1875 = vmatpush3.xpose.msk.msra.mxu0 %vm185_vm0, %v100_v54 }
  0x67   :  { %1915 = vmatpush3.xpose.msk.msra.mxu1 %vm185_vm0, %v132_v55  ;;  %1876 = vmatprep.subr.msk.mxu0 %vm185_vm0, %v115_v56 }
  0x68   :  { %1916 = vmatprep.subr.msk.mxu1 %vm185_vm0, %v147_v57 }
  0x6a   :  { %1877 = vmatpush3.xpose.msk.msra.mxu0 %vm185_vm0, %v99_v58 }
  0x6b   :  { %1917 = vmatpush3.xpose.msk.msra.mxu1 %vm185_vm0, %v131_v59  ;;  %1878 = vmatprep.subr.msk.mxu0 %vm185_vm0, %v114_v60 }
  0x6c   :  { %1918 = vmatprep.subr.msk.mxu1 %vm185_vm0, %v146_v61 }
  0x6e   :  { %1879 = vmatpush3.xpose.msk.msra.mxu0 %vm185_vm0, %v98_v62 }
  0x6f   :  { %1919 = vmatpush3.xpose.msk.msra.mxu1 %vm185_vm0, %v130_v63  ;;  %1880 = vmatprep.subr.msk.mxu0 %vm185_vm0, %v113_v0 }
  0x70   :  { %1920 = vmatprep.subr.msk.mxu1 %vm185_vm0, %v145_v1 }
  0x72   :  { %1881 = vmatpush3.xpose.msk.msra.mxu0 %vm185_vm0, %v97_v2 }
  0x73   :  { %1921 = vmatpush3.xpose.msk.msra.mxu1 %vm185_vm0, %v129_v3  ;;  %1882 = vmatprep.subr.msk.mxu0 %vm185_vm0, %v112_v4 }
  0x74   :  { %1922 = vmatprep.subr.msk.mxu1 %vm185_vm0, %v144_v5 }
  0x76   :  { %1883 = vmatpush3.xpose.msk.msra.mxu0 %vm185_vm0, %v96_v6 }
  0x77   :  { %1923 = vmatpush3.xpose.msk.msra.mxu1 %vm185_vm0, %v128_v7  ;;  %1884 = vmatprep.subr.msk.mxu0 %vm185_vm0, %v111_v8 }
  0x78   :  { %1924 = vmatprep.subr.msk.mxu1 %vm185_vm0, %v143_v9  ;;  %v2674_v9 = vld [vmem:[%s2861_s3] sm:$0xff] }
  0x7a   :  { %1885 = vmatpush3.xpose.msk.msra.mxu0 %vm185_vm0, %v95_v10  ;;  %v2685_v10 = vld [vmem:[%s2861_s3 + $0x8] sm:$0xff] }
  0x7b   :  { %1925 = vmatpush3.xpose.msk.msra.mxu1 %vm185_vm0, %v127_v11  ;;  %1886 = vmatprep.subr.msk.mxu0 %vm185_vm0, %v110_v12  ;;  %v2696_v11 = vld [vmem:[%s2861_s3 + $0x10] sm:$0xff]  ;;  %v2707_v12 = vld [vmem:[%s2861_s3 + $0x18] sm:$0xff]  ;;  %s1969_s3 = smov [#allocation3]  }
  0x7c   :  { %1926 = vmatprep.subr.msk.mxu1 %vm185_vm0, %v142_v13  ;;  %s1610_s12 = sshll.u32 %s1969_s3, 4  ;;  %s1611_s12 = int_to_ptr.vmem [resolvable:$true] %s1610_s12 }
  0x7d   :  { %s1944_s1 = scalar_lea.vmem %s1611_s12, 128  ;;  %p1949_p1 = scmp.lt.s32.totalorder %s1611_s12, %s1611_s12 }
  0x7e   :  { %1887 = vmatpush3.xpose.msk.msra.mxu0 %vm185_vm0, %v94_v14  ;;  %p1945_p0 = scmp.ne.s32.totalorder %s1611_s12, %s1944_s1  ;;  %p1950_p2 = scmp.lt.s32.totalorder %s1944_s1, %s1944_s1 }
  0x7f   :  { %1927 = vmatpush3.xpose.msk.msra.mxu1 %vm185_vm0, %v126_v15  ;;  %1888 = vmatprep.subr.msk.mxu0 %vm185_vm0, %v109_v16 }
  0x80   :  { %1928 = vmatprep.subr.msk.mxu1 %vm185_vm0, %v141_v18  ;;  %p1951_p3 = por %p1950_p2, %p1949_p1 }
  0x82   :  { %1889 = vmatpush3.xpose.msk.msra.mxu0 %vm185_vm0, %v93_v19  ;;  %p1952_p4 = pnand %p1951_p3, %p1945_p0 }
  0x83   :  { %1929 = vmatpush3.xpose.msk.msra.mxu1 %vm185_vm0, %v125_v20 }
  0x85   :  { %1891 = vmatmul.mubr.msk.f32.vlgmr.msra.gmra.mxu0 %vm185_vm0, %v2116_v28 }
  0x86   :  { %1931 = vmatmul.mubr.msk.f32.vlgmr.msra.gmra.mxu1 %vm185_vm0, %v2116_v28  ;;  %1892 = vmatprep.mubr.msk.f32.mxu0 %vm185_vm0, %v2325_v17  ;;  %v1967_v28 = vmov 0.0  }
  0x87   :  { %1932 = vmatprep.mubr.msk.f32.mxu1 %vm185_vm0, %v2325_v17 }
  0x89   :  { %1893 = vmatmul.mubr.msk.f32.gmra.mxu0 %vm185_vm0, %v2325_v17 }
  0x8a   :  { %1933 = vmatmul.mubr.msk.f32.gmra.mxu1 %vm185_vm0, %v2325_v17  ;;  %1894 = vmatprep.mubr.msk.f32.mxu0 %vm185_vm0, %v2354_v22 }
  0x8b   :  { %1934 = vmatprep.mubr.msk.f32.mxu1 %vm185_vm0, %v2354_v22 }
  0x8d   :  { %1895 = vmatmul.mubr.msk.f32.gmra.mxu0 %vm185_vm0, %v2354_v22 }
  0x8e   :  { %1935 = vmatmul.mubr.msk.f32.gmra.mxu1 %vm185_vm0, %v2354_v22  ;;  %1896 = vmatprep.mubr.msk.f32.mxu0 %vm185_vm0, %v2383_v27 }
  0x8f   :  { %1936 = vmatprep.mubr.msk.f32.mxu1 %vm185_vm0, %v2383_v27  ;;  %v2649_v33 = vpop.permute.xlu1 %172 }
  0x91   :  { %1897 = vmatmul.mubr.msk.f32.gmra.mxu0 %vm185_vm0, %v2383_v27  ;;  %v2647_v24 = vpop.permute.xlu0 %182 }
  0x92   :  { %1937 = vmatmul.mubr.msk.f32.gmra.mxu1 %vm185_vm0, %v2383_v27  ;;  %1075 = vmatprep.mubr.f32.mxu0 %v1967_v28 }
  0x93   :  { %1164 = vmatprep.mubr.f32.mxu1 %v1967_v28 }
  0xb0   :  { %v2651_v27 = vpop.permute.xlu0 %177  ;;  %v2663_v50 = vpop.permute.xlu1 %167 }
 0x105   :  { %v648_v17 = vpop.f32.mrf.mxu0 }
 0x106   :  { %v737_v21 = vpop.f32.mrf.mxu1  ;;  %v649_v3 = vadd.f32 %v648_v17, %v2663_v50 }
 0x107   :  { %v650_v22 = vpop.f32.mrf.mxu0  ;;  %v738_v4 = vadd.f32 %v737_v21, %v2663_v50 }
 0x108   :  { %v739_v23 = vpop.f32.mrf.mxu1  ;;  %v651_v61 = vadd.f32 %v650_v22, %v2663_v50  ;;  %v938_v7 = vmax.f32 %v649_v3, 0.0 }
 0x109   :  { %v654_v25 = vpop.f32.mrf.mxu0  ;;  %v740_v62 = vadd.f32 %v739_v23, %v2663_v50  ;;  %v940_v8 = vmax.f32 %v738_v4, 0.0 }
 0x10a   :  { %v743_v26 = vpop.f32.mrf.mxu1  ;;  %v655_v51 = vadd.f32 %v654_v25, %v2649_v33  ;;  %v939_v5 = vmax.f32 %v651_v61, 0.0 }
 0x10b   :  { %v656_v29 = vpop.f32.mrf.mxu0  ;;  %v744_v52 = vadd.f32 %v743_v26, %v2649_v33  ;;  %v941_v6 = vmax.f32 %v740_v62, 0.0 }
 0x10c   :  { %v745_v30 = vpop.f32.mrf.mxu1  ;;  %v657_v46 = vadd.f32 %v656_v29, %v2649_v33  ;;  %v946_v1 = vmax.f32 %v655_v51, 0.0 }
 0x10d   :  { %v660_v31 = vpop.f32.mrf.mxu0  ;;  %v746_v47 = vadd.f32 %v745_v30, %v2649_v33  ;;  %v948_v2 = vmax.f32 %v744_v52, 0.0 }
 0x10e   :  { %v749_v32 = vpop.f32.mrf.mxu1  ;;  %v661_v44 = vadd.f32 %v660_v31, %v2651_v27  ;;  %v947_v63 = vmax.f32 %v657_v46, 0.0 }
 0x10f   :  { %v662_v34 = vpop.f32.mrf.mxu0  ;;  %v750_v45 = vadd.f32 %v749_v32, %v2651_v27  ;;  %v949_v0 = vmax.f32 %v746_v47, 0.0 }
 0x110   :  { %v751_v35 = vpop.f32.mrf.mxu1  ;;  %v663_v40 = vadd.f32 %v662_v34, %v2651_v27  ;;  %v954_v59 = vmax.f32 %v661_v44, 0.0 }
 0x111   :  { %v666_v36 = vpop.f32.mrf.mxu0  ;;  %v752_v41 = vadd.f32 %v751_v35, %v2651_v27  ;;  %v956_v60 = vmax.f32 %v750_v45, 0.0 }
 0x112   :  { %v755_v37 = vpop.f32.mrf.mxu1  ;;  %v667_v38 = vadd.f32 %v666_v36, %v2647_v24  ;;  %v955_v57 = vmax.f32 %v663_v40, 0.0 }
 0x113   :  { %v756_v39 = vadd.f32 %v755_v37, %v2647_v24  ;;  %v668_v42 = vpop.f32.mrf.mxu0  ;;  %v957_v58 = vmax.f32 %v752_v41, 0.0 }
 0x114   :  { %v757_v43 = vpop.f32.mrf.mxu1  ;;  %v669_v48 = vadd.f32 %v668_v42, %v2647_v24  ;;  %v962_v53 = vmax.f32 %v667_v38, 0.0 }
 0x115   :  { %v758_v49 = vadd.f32 %v757_v43, %v2647_v24  ;;  %v964_v54 = vmax.f32 %v756_v39, 0.0 }
 0x116   :  { %v963_v55 = vmax.f32 %v669_v48, 0.0 }
 0x117   :  { %v965_v56 = vmax.f32 %v758_v49, 0.0 }
 0x118   :  { %1035 = vmatprep.subr.mxu0 %v963_v55 }
 0x119   :  { %1124 = vmatprep.subr.mxu1 %v965_v56  ;;  %1036 = vmatpush1.msra.mxu0 %v962_v53 }
 0x11a   :  { %1125 = vmatpush1.msra.mxu1 %v964_v54  ;;  %1037 = vmatprep.subr.mxu0 %v955_v57 }
 0x11b   :  { %1126 = vmatprep.subr.mxu1 %v957_v58  ;;  %1038 = vmatpush1.msra.mxu0 %v954_v59 }
 0x11c   :  { %1127 = vmatpush1.msra.mxu1 %v956_v60  ;;  %1039 = vmatprep.subr.mxu0 %v947_v63 }
 0x11d   :  { %1128 = vmatprep.subr.mxu1 %v949_v0  ;;  %1040 = vmatpush1.msra.mxu0 %v946_v1 }
 0x11e   :  { %1129 = vmatpush1.msra.mxu1 %v948_v2  ;;  %1041 = vmatprep.subr.mxu0 %v939_v5 }
 0x11f   :  { %1130 = vmatprep.subr.mxu1 %v941_v6  ;;  %1042 = vmatpush1.msra.mxu0 %v938_v7 }
 0x120   :  { %1131 = vmatpush1.msra.mxu1 %v940_v8  ;;  %1762 = vmatmul.mubr.msk.f32.vlgmr.msra.gmra.mxu0 %vm998_vm1, %v2674_v9  ;;  %v2753_v8 = vpop.permute.xlu0 %980 }
 0x121   :  { %1766 = vmatmul.mubr.msk.f32.vlgmr.msra.gmra.mxu1 %vm998_vm1, %v2674_v9  ;;  %1081 = vmatprep.mubr.f32.mxu0 %v1967_v28 }
 0x122   :  { %1170 = vmatprep.mubr.f32.mxu1 %v1967_v28 }
 0x124   :  { %1763 = vmatmul.mubr.msk.f32.gmra.mxu0 %vm998_vm1, %v2685_v10 }
 0x125   :  { %1767 = vmatmul.mubr.msk.f32.gmra.mxu1 %vm998_vm1, %v2685_v10  ;;  %1087 = vmatprep.mubr.f32.mxu0 %v1967_v28 }
 0x126   :  { %1176 = vmatprep.mubr.f32.mxu1 %v1967_v28 }
 0x128   :  { %1764 = vmatmul.mubr.msk.f32.gmra.mxu0 %vm998_vm1, %v2696_v11 }
 0x129   :  { %1768 = vmatmul.mubr.msk.f32.gmra.mxu1 %vm998_vm1, %v2696_v11  ;;  %1093 = vmatprep.mubr.f32.mxu0 %v1967_v28 }
 0x12a   :  { %1182 = vmatprep.mubr.f32.mxu1 %v1967_v28 }
 0x12c   :  { %1765 = vmatmul.mubr.msk.f32.gmra.mxu0 %vm998_vm1, %v2707_v12 }
 0x12d   :  { %1769 = vmatmul.mubr.msk.f32.gmra.mxu1 %vm998_vm1, %v2707_v12  ;;  %1253 = vmatprep.mubr.f32.mxu0 %v1967_v28 }
 0x12e   :  { %1342 = vmatprep.mubr.f32.mxu1 %v1967_v28 }
 0x145   :  { %v826_v13 = vpop.f32.mrf.mxu0 }
 0x146   :  { %v915_v14 = vpop.f32.mrf.mxu1 }
 0x147   :  { %v828_v15 = vpop.f32.mrf.mxu0  ;;  %v916_v53 = vadd.f32 %v915_v14, %v2663_v50 }
 0x148   :  { %v917_v16 = vpop.f32.mrf.mxu1  ;;  %v829_v49 = vadd.f32 %v828_v15, %v2663_v50 }
 0x149   :  { %v832_v18 = vpop.f32.mrf.mxu0  ;;  %v944_v62 = vmax.f32 %v916_v53, 0.0 }
 0x14a   :  { %v921_v19 = vpop.f32.mrf.mxu1  ;;  %v833_v45 = vadd.f32 %v832_v18, %v2649_v33  ;;  %v943_v59 = vmax.f32 %v829_v49, 0.0 }
 0x14b   :  { %v834_v20 = vpop.f32.mrf.mxu0  ;;  %v922_v46 = vadd.f32 %v921_v19, %v2649_v33 }
 0x14c   :  { %v923_v17 = vpop.f32.mrf.mxu1  ;;  %v835_v41 = vadd.f32 %v834_v20, %v2649_v33  ;;  %v950_v57 = vmax.f32 %v833_v45, 0.0 }
 0x14d   :  { %v838_v21 = vpop.f32.mrf.mxu0  ;;  %v924_v42 = vadd.f32 %v923_v17, %v2649_v33  ;;  %v952_v58 = vmax.f32 %v922_v46, 0.0 }
 0x14e   :  { %v927_v22 = vpop.f32.mrf.mxu1  ;;  %v839_v39 = vadd.f32 %v838_v21, %v2651_v27  ;;  %v951_v56 = vmax.f32 %v835_v41, 0.0 }
 0x14f   :  { %v840_v23 = vpop.f32.mrf.mxu0  ;;  %v928_v40 = vadd.f32 %v927_v22, %v2651_v27  ;;  %v953_v33 = vmax.f32 %v924_v42, 0.0 }
 0x150   :  { %v929_v25 = vpop.f32.mrf.mxu1  ;;  %v841_v35 = vadd.f32 %v840_v23, %v2651_v27  ;;  %v958_v54 = vmax.f32 %v839_v39, 0.0 }
 0x151   :  { %v844_v26 = vpop.f32.mrf.mxu0  ;;  %v930_v36 = vadd.f32 %v929_v25, %v2651_v27  ;;  %v827_v27 = vadd.f32 %v826_v13, %v2663_v50  ;;  %v960_v55 = vmax.f32 %v928_v40, 0.0 }
 0x152   :  { %v933_v29 = vpop.f32.mrf.mxu1  ;;  %v845_v30 = vadd.f32 %v844_v26, %v2647_v24  ;;  %v959_v51 = vmax.f32 %v841_v35, 0.0 }
 0x153   :  { %v934_v31 = vadd.f32 %v933_v29, %v2647_v24  ;;  %v846_v32 = vpop.f32.mrf.mxu0  ;;  %v961_v52 = vmax.f32 %v930_v36, 0.0  ;;  %v942_v61 = vmax.f32 %v827_v27, 0.0 }
 0x154   :  { %v935_v34 = vpop.f32.mrf.mxu1  ;;  %v847_v37 = vadd.f32 %v846_v32, %v2647_v24  ;;  %v966_v47 = vmax.f32 %v845_v30, 0.0 }
 0x155   :  { %v936_v38 = vadd.f32 %v935_v34, %v2647_v24  ;;  %v968_v48 = vmax.f32 %v934_v31, 0.0  ;;  %v918_v24 = vadd.f32 %v917_v16, %v2663_v50 }
 0x156   :  { %v967_v43 = vmax.f32 %v847_v37, 0.0 }
 0x157   :  { %v969_v44 = vmax.f32 %v936_v38, 0.0  ;;  %v945_v60 = vmax.f32 %v918_v24, 0.0 }
 0x158   :  { %1213 = vmatprep.subr.mxu0 %v967_v43 }
 0x159   :  { %1302 = vmatprep.subr.mxu1 %v969_v44  ;;  %1214 = vmatpush1.msra.mxu0 %v966_v47 }
 0x15a   :  { %1303 = vmatpush1.msra.mxu1 %v968_v48  ;;  %1215 = vmatprep.subr.mxu0 %v959_v51 }
 0x15b   :  { %1304 = vmatprep.subr.mxu1 %v961_v52  ;;  %1216 = vmatpush1.msra.mxu0 %v958_v54 }
 0x15c   :  { %1305 = vmatpush1.msra.mxu1 %v960_v55  ;;  %1217 = vmatprep.subr.mxu0 %v951_v56 }
 0x15d   :  { %1306 = vmatprep.subr.mxu1 %v953_v33  ;;  %1218 = vmatpush1.msra.mxu0 %v950_v57 }
 0x15e   :  { %1307 = vmatpush1.msra.mxu1 %v952_v58  ;;  %1219 = vmatprep.subr.mxu0 %v943_v59 }
 0x15f   :  { %1308 = vmatprep.subr.mxu1 %v945_v60  ;;  %1220 = vmatpush1.msra.mxu0 %v942_v61 }
 0x160   :  { %1309 = vmatpush1.msra.mxu1 %v944_v62  ;;  %1770 = vmatmul.mubr.msk.f32.vlgmr.msra.gmra.mxu0 %vm998_vm1, %v2674_v9 }
 0x161   :  { %1774 = vmatmul.mubr.msk.f32.vlgmr.msra.gmra.mxu1 %vm998_vm1, %v2674_v9  ;;  %1259 = vmatprep.mubr.f32.mxu0 %v1967_v28  ;;  %v2755_v9 = vpop.permute.xlu1 %985 }
 0x162   :  { %1348 = vmatprep.mubr.f32.mxu1 %v1967_v28 }
 0x164   :  { %1771 = vmatmul.mubr.msk.f32.gmra.mxu0 %vm998_vm1, %v2685_v10 }
 0x165   :  { %1775 = vmatmul.mubr.msk.f32.gmra.mxu1 %vm998_vm1, %v2685_v10  ;;  %1265 = vmatprep.mubr.f32.mxu0 %v1967_v28  ;;  %v2759_v14 = vpop.permute.xlu1 %995 }
 0x166   :  { %1354 = vmatprep.mubr.f32.mxu1 %v1967_v28 }
 0x168   :  { %1772 = vmatmul.mubr.msk.f32.gmra.mxu0 %vm998_vm1, %v2696_v11 }
 0x169   :  { %1776 = vmatmul.mubr.msk.f32.gmra.mxu1 %vm998_vm1, %v2696_v11  ;;  %1271 = vmatprep.mubr.f32.mxu0 %v1967_v28  ;;  %v2757_v11 = vpop.permute.xlu0 %990  ;;  %v2777_v38 = vpop.permute.xlu1 %1410 }
 0x16a   :  { %1360 = vmatprep.mubr.f32.mxu1 %v1967_v28 }
 0x16c   :  { %1773 = vmatmul.mubr.msk.f32.gmra.mxu0 %vm998_vm1, %v2707_v12 }
 0x16d   :  { %1777 = vmatmul.mubr.msk.f32.gmra.mxu1 %vm998_vm1, %v2707_v12  ;;  %v2769_v26 = vpop.permute.xlu0 %1405  ;;  %v2791_v62 = vpop.permute.xlu1 %1420 }
 0x171   :  { %v2783_v54 = vpop.permute.xlu0 %1415 }
 0x1e0   :  { %v1077_v50 = vpop.f32.mrf.mxu0 }
 0x1e1   :  { %v1166_v63 = vpop.f32.mrf.mxu1  ;;  %v1078_v29 = vadd.f32 %v1077_v50, %v2753_v8 }
 0x1e2   :  { %v1079_v0 = vpop.f32.mrf.mxu0  ;;  %v1167_v30 = vadd.f32 %v1166_v63, %v2753_v8 }
 0x1e3   :  { %v1168_v1 = vpop.f32.mrf.mxu1  ;;  %v1080_v18 = vadd.f32 %v1079_v0, %v2753_v8  ;;  %v1367_v47 = vmax.f32 %v1078_v29, 0.0  ;;  %v1533_v29 = vlaneseq }
 0x1e4   :  { %v1083_v2 = vpop.f32.mrf.mxu0  ;;  %v1169_v19 = vadd.f32 %v1168_v1, %v2753_v8  ;;  %v1369_v48 = vmax.f32 %v1167_v30, 0.0 }
 0x1e5   :  { %v1172_v3 = vpop.f32.mrf.mxu1  ;;  %v1084_v20 = vadd.f32 %v1083_v2, %v2755_v9  ;;  %v1368_v39 = vmax.f32 %v1080_v18, 0.0  ;;  %v1423_v50 = vmul.f32 %v2769_v26, %v1367_v47 }
 0x1e6   :  { %v1085_v4 = vpop.f32.mrf.mxu0  ;;  %v1173_v17 = vadd.f32 %v1172_v3, %v2755_v9  ;;  %v1370_v40 = vmax.f32 %v1169_v19, 0.0  ;;  %v1425_v63 = vmul.f32 %v2769_v26, %v1369_v48 }
 0x1e7   :  { %v1174_v5 = vpop.f32.mrf.mxu1  ;;  %v1086_v15 = vadd.f32 %v1085_v4, %v2755_v9  ;;  %v1375_v41 = vmax.f32 %v1084_v20, 0.0  ;;  %v1424_v55 = vmul.f32 %v2769_v26, %v1368_v39 }
 0x1e8   :  { %v1089_v6 = vpop.f32.mrf.mxu0  ;;  %v1175_v16 = vadd.f32 %v1174_v5, %v2755_v9  ;;  %v1377_v42 = vmax.f32 %v1173_v17, 0.0  ;;  %v1426_v56 = vmul.f32 %v2769_v26, %v1370_v40 }
 0x1e9   :  { %v1178_v7 = vpop.f32.mrf.mxu1  ;;  %v1376_v31 = vmax.f32 %v1086_v15, 0.0  ;;  %v1090_v34 = vadd.f32 %v1089_v6, %v2757_v11  ;;  %v1431_v33 = vmul.f32 %v2777_v38, %v1375_v41 }
 0x1ea   :  { %v1091_v28 = vpop.f32.mrf.mxu0  ;;  %v1378_v32 = vmax.f32 %v1175_v16, 0.0  ;;  %v1179_v35 = vadd.f32 %v1178_v7, %v2757_v11  ;;  %v1433_v57 = vmul.f32 %v2777_v38, %v1377_v42 }
 0x1eb   :  { %v1180_v10 = vpop.f32.mrf.mxu1  ;;  %v1092_v23 = vadd.f32 %v1091_v28, %v2757_v11  ;;  %v1432_v49 = vmul.f32 %v2777_v38, %v1376_v31  ;;  %v1383_v51 = vmax.f32 %v1090_v34, 0.0  ;;  %v1455_v6 = vadd.f32 %v1431_v33, %v1423_v50 }
 0x1ec   :  { %v1095_v13 = vpop.f32.mrf.mxu0  ;;  %v1181_v25 = vadd.f32 %v1180_v10, %v2757_v11  ;;  %v1434_v24 = vmul.f32 %v2777_v38, %v1378_v32  ;;  %v1385_v52 = vmax.f32 %v1179_v35, 0.0  ;;  %v1473_v7 = vadd.f32 %v1433_v57, %v1425_v63 }
 0x1ed   :  { %v1184_v12 = vpop.f32.mrf.mxu1  ;;  %v1384_v43 = vmax.f32 %v1092_v23, 0.0  ;;  %v1096_v45 = vadd.f32 %v1095_v13, %v2759_v14  ;;  %v1464_v0 = vadd.f32 %v1432_v49, %v1424_v55  ;;  %v1439_v2 = vmul.f32 %v2783_v54, %v1383_v51 }
 0x1ee   :  { %v1097_v21 = vpop.f32.mrf.mxu0  ;;  %v1386_v44 = vmax.f32 %v1181_v25, 0.0  ;;  %v1185_v46 = vadd.f32 %v1184_v12, %v2759_v14  ;;  %v1482_v1 = vadd.f32 %v1434_v24, %v1426_v56  ;;  %v1441_v3 = vmul.f32 %v2783_v54, %v1385_v52 }
 0x1ef   :  { %v1186_v22 = vpop.f32.mrf.mxu1  ;;  %v1098_v36 = vadd.f32 %v1097_v21, %v2759_v14  ;;  %v1440_v58 = vmul.f32 %v2783_v54, %v1384_v43  ;;  %v1391_v60 = vmax.f32 %v1096_v45, 0.0  ;;  %v1456_v15 = vadd.f32 %v1455_v6, %v1439_v2 }
 0x1f0   :  { %v1187_v37 = vadd.f32 %v1186_v22, %v2759_v14  ;;  %v1442_v59 = vmul.f32 %v2783_v54, %v1386_v44  ;;  %v1393_v61 = vmax.f32 %v1185_v46, 0.0  ;;  %v1474_v16 = vadd.f32 %v1473_v7, %v1441_v3 }
 0x1f1   :  { %v1392_v27 = vmax.f32 %v1098_v36, 0.0  ;;  %v1465_v28 = vadd.f32 %v1464_v0, %v1440_v58  ;;  %v1447_v13 = vmul.f32 %v2791_v62, %v1391_v60 }
 0x1f2   :  { %v1394_v53 = vmax.f32 %v1187_v37, 0.0  ;;  %v1483_v10 = vadd.f32 %v1482_v1, %v1442_v59  ;;  %v1449_v12 = vmul.f32 %v2791_v62, %v1393_v61  ;;  %v2801_v37 = vshrl.u32 %v1533_v29, 7 }
 0x1f3   :  { %v1448_v4 = vmul.f32 %v2791_v62, %v1392_v27  ;;  %v1457_v20 = vadd.f32 %v1456_v15, %v1447_v13 }
 0x1f4   :  { %v1450_v5 = vmul.f32 %v2791_v62, %v1394_v53  ;;  %v1475_v17 = vadd.f32 %v1474_v16, %v1449_v12  ;;  %v1535_v51 = vsub.s32 0, %v2801_v37 }
 0x1f5   :  { %v1466_v18 = vadd.f32 %v1465_v28, %v1448_v4  ;;  %v1458_v23 = vrot.slane %v1457_v20, 4 }
 0x1f6   :  { %v1484_v19 = vadd.f32 %v1483_v10, %v1450_v5  ;;  %v1476_v25 = vrot.slane %v1475_v17, 4 }
 0x1f7   :  { %v1467_v21 = vrot.slane %v1466_v18, 4  ;;  %v1459_v32 = vadd.f32 %v1458_v23, %v1457_v20 }
 0x1f8   :  { %v1485_v22 = vrot.slane %v1484_v19, 4  ;;  %v1477_v34 = vadd.f32 %v1476_v25, %v1475_v17 }
 0x1f9   :  { %v1468_v30 = vadd.f32 %v1467_v21, %v1466_v18  ;;  %v1460_v45 = vrot.slane %v1459_v32, 2 }
 0x1fa   :  { %v1486_v31 = vadd.f32 %v1485_v22, %v1484_v19  ;;  %v1478_v46 = vrot.slane %v1477_v34, 2 }
 0x1fb   :  { %v1469_v39 = vrot.slane %v1468_v30, 2  ;;  %v2814_v59 = vadd.f32 %v1460_v45, %v1459_v32 }
 0x1fc   :  { %v1487_v40 = vrot.slane %v1486_v31, 2  ;;  %v2816_v60 = vadd.f32 %v1478_v46, %v1477_v34 }
 0x1fd   :  { %v2808_v52 = vadd.f32 %v1469_v39, %v1468_v30 }
 0x1fe   :  { %v2810_v27 = vadd.f32 %v1487_v40, %v1486_v31 }
 0x1ff   :  { %v1471_v28 = vrot.slane %v2808_v52, 1 }
 0x200   :  { %v1489_v10 = vrot.slane %v2810_v27, 1 }
 0x220   :  { %v1255_v35 = vpop.f32.mrf.mxu0 }
 0x221   :  { %v1344_v36 = vpop.f32.mrf.mxu1  ;;  %v1256_v41 = vadd.f32 %v1255_v35, %v2753_v8 }
 0x222   :  { %v1345_v42 = vadd.f32 %v1344_v36, %v2753_v8  ;;  %v1257_v43 = vpop.f32.mrf.mxu0 }
 0x223   :  { %v1346_v44 = vpop.f32.mrf.mxu1  ;;  %v1258_v47 = vadd.f32 %v1257_v43, %v2753_v8  ;;  %v1371_v53 = vmax.f32 %v1256_v41, 0.0 }
 0x224   :  { %v1347_v48 = vadd.f32 %v1346_v44, %v2753_v8  ;;  %v1261_v49 = vpop.f32.mrf.mxu0  ;;  %v1373_v55 = vmax.f32 %v1345_v42, 0.0 }
 0x225   :  { %v1350_v24 = vpop.f32.mrf.mxu1  ;;  %v1262_v56 = vadd.f32 %v1261_v49, %v2755_v9  ;;  %v1372_v50 = vmax.f32 %v1258_v47, 0.0  ;;  %v1427_v13 = vmul.f32 %v2769_v26, %v1371_v53 }
 0x226   :  { %v1351_v33 = vadd.f32 %v1350_v24, %v2755_v9  ;;  %v1263_v57 = vpop.f32.mrf.mxu0  ;;  %v1374_v63 = vmax.f32 %v1347_v48, 0.0 }
 0x227   :  { %v1352_v58 = vpop.f32.mrf.mxu1  ;;  %v1264_v8 = vadd.f32 %v1263_v57, %v2755_v9  ;;  %v1379_v0 = vmax.f32 %v1262_v56, 0.0  ;;  %v1428_v17 = vmul.f32 %v2769_v26, %v1372_v50  ;;  %v1531_v50 = vpop.permute.xlu0 %1530 }
 0x228   :  { %v1353_v61 = vadd.f32 %v1352_v58, %v2755_v9  ;;  %v1381_v1 = vmax.f32 %v1351_v33, 0.0  ;;  %v1267_v2 = vpop.f32.mrf.mxu0  ;;  %v1429_v9 = vmul.f32 %v2769_v26, %v1373_v55  ;;  %v1430_v21 = vmul.f32 %v2769_v26, %v1374_v63 }
 0x229   :  { %v1356_v3 = vpop.f32.mrf.mxu1  ;;  %v1380_v4 = vmax.f32 %v1264_v8, 0.0  ;;  %v1268_v6 = vadd.f32 %v1267_v2, %v2757_v11  ;;  %v1435_v16 = vmul.f32 %v2777_v38, %v1379_v0  ;;  %v1480_v63 = vrot.slane %v2816_v60, 1 }
 0x22a   :  { %v1382_v5 = vmax.f32 %v1353_v61, 0.0  ;;  %v1357_v7 = vadd.f32 %v1356_v3, %v2757_v11  ;;  %v1269_v12 = vpop.f32.mrf.mxu0  ;;  %v1437_v18 = vmul.f32 %v2777_v38, %v1381_v1  ;;  %v1968_v2 = vmov 1966171168  }
 0x22b   :  { %v1358_v15 = vpop.f32.mrf.mxu1  ;;  %v1387_v19 = vmax.f32 %v1268_v6, 0.0  ;;  %v1270_v22 = vadd.f32 %v1269_v12, %v2757_v11  ;;  %v1436_v30 = vmul.f32 %v2777_v38, %v1380_v4  ;;  %v1491_v42 = vadd.f32 %v1435_v16, %v1427_v13 }
 0x22c   :  { %v1389_v20 = vmax.f32 %v1357_v7, 0.0  ;;  %v1359_v23 = vadd.f32 %v1358_v15, %v2757_v11  ;;  %v1273_v25 = vpop.f32.mrf.mxu0  ;;  %v1438_v31 = vmul.f32 %v2777_v38, %v1382_v5  ;;  %v1509_v11 = vadd.f32 %v1437_v18, %v1429_v9 }
 0x22d   :  { %v1362_v29 = vpop.f32.mrf.mxu1  ;;  %v1443_v32 = vmul.f32 %v2783_v54, %v1387_v19  ;;  %v1388_v35 = vmax.f32 %v1270_v22, 0.0  ;;  %v1274_v39 = vadd.f32 %v1273_v25, %v2759_v14  ;;  %v1500_v48 = vadd.f32 %v1436_v30, %v1428_v17 }
 0x22e   :  { %v1445_v34 = vmul.f32 %v2783_v54, %v1389_v20  ;;  %v1390_v36 = vmax.f32 %v1359_v23, 0.0  ;;  %v1363_v26 = vadd.f32 %v1362_v29, %v2759_v14  ;;  %v1275_v40 = vpop.f32.mrf.mxu0  ;;  %v1518_v49 = vadd.f32 %v1438_v31, %v1430_v21 }
 0x22f   :  { %v1364_v41 = vpop.f32.mrf.mxu1  ;;  %v1276_v43 = vadd.f32 %v1275_v40, %v2759_v14  ;;  %v1444_v38 = vmul.f32 %v2783_v54, %v1388_v35  ;;  %v1395_v46 = vmax.f32 %v1274_v39, 0.0  ;;  %v1492_v55 = vadd.f32 %v1491_v42, %v1443_v32 }
 0x230   :  { %v1365_v44 = vadd.f32 %v1364_v41, %v2759_v14  ;;  %v1446_v45 = vmul.f32 %v2783_v54, %v1390_v36  ;;  %v1397_v47 = vmax.f32 %v1363_v26, 0.0  ;;  %v1510_v56 = vadd.f32 %v1509_v11, %v1445_v34 }
 0x231   :  { %v1396_v24 = vmax.f32 %v1276_v43, 0.0  ;;  %v1451_v33 = vmul.f32 %v2791_v62, %v1395_v46  ;;  %v1501_v58 = vadd.f32 %v1500_v48, %v1444_v38  ;;  %v1462_v54 = vrot.slane %v2814_v59, 1 }
 0x232   :  { %v1398_v53 = vmax.f32 %v1365_v44, 0.0  ;;  %v1453_v57 = vmul.f32 %v2791_v62, %v1397_v47  ;;  %v1519_v8 = vadd.f32 %v1518_v49, %v1446_v45  ;;  %v1558_v3 = vunpack.c.l.s4 %v1968_v2 }
 0x233   :  { %v1452_v14 = vmul.f32 %v2791_v62, %v1396_v24  ;;  %v1493_v0 = vadd.f32 %v1492_v55, %v1451_v33  ;;  %v1472_v6 = vadd.f32 %v1471_v28, %v2808_v52  ;;  %v1490_v7 = vadd.f32 %v1489_v10, %v2810_v27 }
 0x234   :  { %v1454_v61 = vmul.f32 %v2791_v62, %v1398_v53  ;;  %v1511_v1 = vadd.f32 %v1510_v56, %v1453_v57  ;;  %v1536_v62 = vrot.slane %v1531_v50, %v1535_v51  ;;  %v1463_v16 = vadd.f32 %v1462_v54, %v2814_v59 }
 0x235   :  { %v1502_v4 = vadd.f32 %v1501_v58, %v1452_v14  ;;  %v1494_v13 = vrot.slane %v1493_v0, 4  ;;  %v1481_v18 = vadd.f32 %v1480_v63, %v2816_v60  ;;  %v1559_v17 = vunpack.c.0.s8 %v1558_v3 }
 0x236   :  { %v1520_v5 = vadd.f32 %v1519_v8, %v1454_v61  ;;  %v1512_v9 = vrot.slane %v1511_v1, 4  ;;  %v1538_v28 = vadd.f32 %v1536_v62, %v1472_v6  ;;  %v1540_v27 = vadd.f32 %v1536_v62, %v1490_v7 }
 0x237   :  { %v1503_v12 = vrot.slane %v1502_v4, 4  ;;  %v1495_v19 = vadd.f32 %v1494_v13, %v1493_v0  ;;  %v1537_v51 = vadd.f32 %v1536_v62, %v1463_v16  ;;  %v1539_v31 = vadd.f32 %v1536_v62, %v1481_v18 }
 0x238   :  { %v1521_v15 = vrot.slane %v1520_v5, 4  ;;  %v1513_v20 = vadd.f32 %v1512_v9, %v1511_v1  ;;  %v1562_v32 = vsub.s32 %v1559_v17, %v2801_v37 }
 0x239   :  { %v1504_v21 = vadd.f32 %v1503_v12, %v1502_v4  ;;  %v1496_v23 = vrot.slane %v1495_v19, 2  ;;  %v1553_v36 = vcombine.low %v1537_v51, %v1538_v28  ;;  %v1554_v39 = vcombine.low %v1539_v31, %v1540_v27 }
 0x23a   :  { %v1522_v22 = vadd.f32 %v1521_v15, %v1520_v5  ;;  %v1514_v52 = vrot.slane %v1513_v20, 2 }
 0x23b   :  { %v1505_v10 = vrot.slane %v1504_v21, 2  ;;  %v1497_v29 = vadd.f32 %v1496_v23, %v1495_v19  ;;  %v1563_v44 = vrot.slane %v1553_v36, %v1562_v32  ;;  %v1570_v38 = vrot.slane %v1554_v39, %v1562_v32 }
 0x23c   :  { %v1523_v25 = vrot.slane %v1522_v22, 2  ;;  %v1515_v30 = vadd.f32 %v1514_v52, %v1513_v20 }
 0x23d   :  { %v1506_v59 = vadd.f32 %v1505_v10, %v1504_v21  ;;  %v1498_v60 = vrot.slane %v1497_v29, 1  ;;  %v1585_v55 = vcombine.low %v1563_v44, %v1570_v38 }
 0x23e   :  { %v1524_v34 = vadd.f32 %v1523_v25, %v1522_v22  ;;  %v1516_v35 = vrot.slane %v1515_v30, 1 }
 0x23f   :  { %v1507_v26 = vrot.slane %v1506_v59, 1  ;;  %v1499_v41 = vadd.f32 %v1498_v60, %v1497_v29  ;;  %v1593_v33 = vrot.slane %v1585_v55, %v1562_v32 }
 0x240   :  { %v1525_v40 = vrot.slane %v1524_v34, 1  ;;  %v1517_v42 = vadd.f32 %v1516_v35, %v1515_v30 }
 0x241   :  { %v1508_v11 = vadd.f32 %v1507_v26, %v1506_v59  ;;  %v1541_v45 = vadd.f32 %v1536_v62, %v1499_v41 }
 0x242   :  { %v1526_v43 = vadd.f32 %v1525_v40, %v1524_v34  ;;  %v1543_v47 = vadd.f32 %v1536_v62, %v1517_v42 }
 0x243   :  { %v1542_v46 = vadd.f32 %v1536_v62, %v1508_v11 }
 0x244   :  { %v1544_v48 = vadd.f32 %v1536_v62, %v1526_v43 }
 0x245   :  { %v1555_v49 = vcombine.low %v1541_v45, %v1542_v46 }
 0x246   :  { %v1556_v37 = vcombine.low %v1543_v47, %v1544_v48 }
 0x247   :  { %v1577_v24 = vrot.slane %v1555_v49, %v1562_v32 }
 0x248   :  { %v1584_v53 = vrot.slane %v1556_v37, %v1562_v32 }
 0x24a   :  { %v1586_v56 = vcombine.low %v1577_v24, %v1584_v53 }
 0x24c   :  { %v1600_v57 = vrot.slane %v1586_v56, %v1562_v32 }
 0x24e   :  { %v1601_v58 = vcombine.low %v1593_v33, %v1600_v57 }
 0x250   :  { %1603 = vst [vmem:[#allocation3] sm:$0xff] %v1601_v58 }
 0x251   :  { %1955 = shalt.err (!%p1952_p4)
}
 0x252   :  { %1613 = dma.vmem_to_hbm [thread:$0]  %s1611_s12, 128, %s2865_s7, [#allocation4]  }
 0x253   :  { %1964 = dma.done.wait [#allocation4], 128  }
 0x254   :  { %1965 = vsyncadd [#allocation4], 4294967168 }
 0x255   :  { %1617 = vsyncpa [#allocation4], 1 }

</bundles_post_ra>
